<compile_context>
chip_gen: v7x
topology: tpu7x:2x2x1
jax: 0.10.0
libtpu: 0.0.40
codegen_flags: <defaults>
</compile_context>

<pallas_src>
import math

import jax
import jax.numpy as jnp
from jax.experimental import pallas as pl
from jax.experimental.pallas import tpu as pltpu


# --------------------------------------------------------------------------- #
# Tiling helper
# --------------------------------------------------------------------------- #
def _pick_block_b(B, block_b=None):
    """Batch tile: large & pipelineable, multiple of 8, >=2 grid steps when the
    batch allows it (v7x megacore), capped at 1024 rows so double-buffered
    tiles stay far below every generation's default scoped-VMEM limit."""
    if block_b is not None:
        return block_b
    if B <= 16:
        return B                       # single tile; block == full dim is legal
    return min(1024, max(8, (B // 2) // 8 * 8))


# --------------------------------------------------------------------------- #
# Fast path: K = A*E <= 256  ->  one block-diagonal MXU matmul
# --------------------------------------------------------------------------- #
def _attr_gnn_packed_kernel(x_ref, wbd_ref, r_ref, out_ref):
    # x_ref   : VMEM (block_b, K)  packed activations (lane-dense, K = A*E)
    # wbd_ref : VMEM (K, K)        block-diagonal per-type projections (resident)
    # r_ref   : VMEM (K, E)        stacked identity * sw[a] (post-ReLU reduction)
    # out_ref : VMEM (block_b, E)  written exactly once
    x = x_ref[...].astype(wbd_ref.dtype)                 # in-kernel (free) cast if bf16
    h = jnp.dot(x, wbd_ref[...], preferred_element_type=jnp.float32)   # MXU
    h = jnp.maximum(h, 0.0)                                            # ReLU in f32 (VPU)
    out_ref[...] = jnp.dot(h.astype(r_ref.dtype), r_ref[...],          # fold sum_a + sw[a]
                           preferred_element_type=jnp.float32).astype(out_ref.dtype)


def prepare_packed_params(edge_space_projection, self_weighted, *, use_bf16_matmul=False):
    """Build the packed parameters ONCE per parameter update (hoisted out of the
    per-forward path).  Returns (w_bd (K,K), r (K,E))."""
    A, E, _ = edge_space_projection.shape
    K = A * E
    # Block-diagonal projection: W_bd[a*E + i, a*E + j] = W[a, i, j]
    eye_a = jnp.eye(A, dtype=edge_space_projection.dtype)
    w_bd = jnp.einsum('aij,ab->aibj', edge_space_projection, eye_a).reshape(K, K)
    # Post-ReLU reduction: R[a*E + i, j] = sw[a] * (i == j).  Applying sw AFTER
    # the ReLU (in R, never in W) keeps semantics correct for negative weights.
    sw = self_weighted.reshape(A, 1, 1).astype(jnp.float32)
    r = (sw * jnp.eye(E, dtype=jnp.float32)).reshape(K, E)
    if use_bf16_matmul:
        # Only the tiny resident operands are cast host-side; the streamed
        # activation is cast inside the kernel (no extra HBM pass).
        w_bd = w_bd.astype(jnp.bfloat16)
        r = r.astype(jnp.bfloat16)
    return w_bd, r


def backward_attribute_gnn_packed(attribute_embeddings, w_bd, r, *, block_b=None):
    """attribute_embeddings: (B, A, E) f32;  w_bd: (K, K);  r: (K, E) -> (B, E) f32."""
    B, A, E = attribute_embeddings.shape
    K = A * E
    assert w_bd.shape == (K, K) and r.shape == (K, E)

    # Lane-dense packing: (B, A, E) -> (B, A*E) is a contiguous reshape (no HBM
    # transpose pass).
    x_packed = attribute_embeddings.reshape(B, K)

    block_b = _pick_block_b(B, block_b)
    grid_b = pl.cdiv(B, block_b)       # partial last tile is masked on writeback

    return pl.pallas_call(
        _attr_gnn_packed_kernel,
        out_shape=jax.ShapeDtypeStruct((B, E), jnp.float32),
        grid_spec=pltpu.PrefetchScalarGridSpec(
            num_scalar_prefetch=0,
            grid=(grid_b,),
            in_specs=[
                # Streamed activation tile.  (If xprof ever shows exposed DMA at
                # large B, add pipeline_mode=pl.Buffered(3) here only.)
                pl.BlockSpec((block_b, K), lambda i: (i, 0)),
                pl.BlockSpec((K, K), lambda i: (0, 0)),   # block-diagonal W (resident)
                pl.BlockSpec((K, E), lambda i: (0, 0)),   # sw-scaled reduction matrix
            ],
            out_specs=pl.BlockSpec((block_b, E), lambda i: (i, 0)),
        ),
        compiler_params=pltpu.CompilerParams(
            dimension_semantics=("parallel",),
        ),
    )(x_packed, w_bd, r)


# --------------------------------------------------------------------------- #
# Large-K path: grid axis over node types + VMEM accumulator (P3)
# --------------------------------------------------------------------------- #
def _attr_gnn_per_type_kernel(x_ref, w_ref, sw_ref, out_ref, acc_ref):
    # x_ref  : VMEM (block_b, E)   per-type activation tile
    # w_ref  : VMEM (E, E)         per-type projection
    # sw_ref : SMEM (A,)           learned self weights
    # acc_ref: VMEM (block_b, E)   f32 accumulator across node types
    a = pl.program_id(1)

    @pl.when(a == 0)
    def _():
        acc_ref[...] = jnp.zeros_like(acc_ref)

    h = jnp.dot(x_ref[...].astype(w_ref.dtype), w_ref[...],
                preferred_element_type=jnp.float32)
    acc_ref[...] += jnp.maximum(h, 0.0) * sw_ref[a]       # sw applied post-ReLU

    @pl.when(a == pl.num_programs(1) - 1)
    def _():
        out_ref[...] = acc_ref[...].astype(out_ref.dtype)


def prepare_per_type_params(edge_space_projection, self_weighted, *, use_bf16_matmul=False):
    w = edge_space_projection
    if use_bf16_matmul:
        w = w.astype(jnp.bfloat16)
    sw = self_weighted.reshape(-1).astype(jnp.float32)
    return w, sw


def backward_attribute_gnn_per_type(attribute_embeddings, w, sw, *, block_b=None):
    B, A, E = attribute_embeddings.shape
    # (A, B, E) layout so each grid step streams a lane-dense (block_b, E) tile.
    x_t = jnp.swapaxes(attribute_embeddings, 0, 1)

    block_b = _pick_block_b(B, block_b)
    grid_b = pl.cdiv(B, block_b)

    return pl.pallas_call(
        _attr_gnn_per_type_kernel,
        out_shape=jax.ShapeDtypeStruct((B, E), jnp.float32),
        grid_spec=pltpu.PrefetchScalarGridSpec(
            num_scalar_prefetch=0,
            grid=(grid_b, A),
            in_specs=[
                pl.BlockSpec((None, block_b, E), lambda i, a: (a, i, 0)),
                pl.BlockSpec((None, E, E), lambda i, a: (a, 0, 0)),
                pl.BlockSpec(memory_space=pltpu.MemorySpace.SMEM),
            ],
            out_specs=pl.BlockSpec((block_b, E), lambda i, a: (i, 0)),
            scratch_shapes=[pltpu.VMEM((block_b, E), jnp.float32)],
        ),
        compiler_params=pltpu.CompilerParams(
            dimension_semantics=("parallel", "arbitrary"),
        ),
    )(x_t, w, sw)


# --------------------------------------------------------------------------- #
# One-shot convenience wrapper (matches the PyTorch module's forward).
# In a real model, call prepare_*_params() once per parameter update and use
# the *_packed / *_per_type entry points directly.
# --------------------------------------------------------------------------- #
def backward_attribute_gnn(attribute_embeddings, edge_space_projection, self_weighted,
                           *, block_b=None, use_bf16_matmul=False):
    B, A, E = attribute_embeddings.shape
    if A * E <= 256:
        w_bd, r = prepare_packed_params(edge_space_projection, self_weighted,
                                        use_bf16_matmul=use_bf16_matmul)
        return backward_attribute_gnn_packed(attribute_embeddings, w_bd, r, block_b=block_b)
    w, sw = prepare_per_type_params(edge_space_projection, self_weighted,
                                    use_bf16_matmul=use_bf16_matmul)
    return backward_attribute_gnn_per_type(attribute_embeddings, w, sw, block_b=block_b)


# --------------------------------------------------------------------------- #
if __name__ == "__main__":
    key = jax.random.PRNGKey(0)

    def reference(x, w, sw):
        p = jnp.einsum('bai,aij->baj', x, w)
        p = jnp.maximum(p, 0.0)
        return jnp.sum(p * sw, axis=1)

    # ---- small config consistent with the module: 4 node types, E=32, batch 8 ----
    A, E, B = 4, 32, 8
    k_x, k_w, k_sw, k_x2, k_x3, k_w3, k_sw3 = jax.random.split(key, 7)

    # kaiming_uniform_ on (A, E, E): bound = sqrt(2) * sqrt(3 / fan_in)
    bound = math.sqrt(2.0) * math.sqrt(3.0 / (E * E))
    w = jax.random.uniform(k_w, (A, E, E), dtype=jnp.float32, minval=-bound, maxval=bound)
    # Non-trivial (possibly negative) self-weights to exercise the post-ReLU scaling.
    sw = jax.random.normal(k_sw, (1, A, 1), dtype=jnp.float32)
    x = jax.random.normal(k_x, (B, A, E), dtype=jnp.float32)
    ref = reference(x, w, sw)

    # 1) Hoisted-parameter usage (params built once, reused per forward), f32 path.
    w_bd, r = prepare_packed_params(w, sw)
    out = jax.block_until_ready(backward_attribute_gnn_packed(x, w_bd, r))
    assert out.shape == (B, E)
    assert jnp.allclose(out, ref, atol=1e-5, rtol=1e-5), "f32 packed kernel mismatch"

    # 2) bf16 MXU operands: tiny resident w_bd / r cast host-side, x / h cast in-kernel.
    w_bd16, r16 = prepare_packed_params(w, sw, use_bf16_matmul=True)
    out16 = jax.block_until_ready(backward_attribute_gnn_packed(x, w_bd16, r16))
    assert jnp.allclose(out16, ref, atol=2e-2, rtol=2e-2), "bf16 packed kernel mismatch"

    # 3) Ragged batch (cdiv grid, masked partial last tile) through the one-shot wrapper.
    B_odd = 20
    x_odd = jax.random.normal(k_x2, (B_odd, A, E), dtype=jnp.float32)
    out_odd = jax.block_until_ready(
        backward_attribute_gnn(x_odd, w, sw, block_b=8))     # grid = cdiv(20, 8) = 3 steps
    assert out_odd.shape == (B_odd, E)
    assert jnp.allclose(out_odd, reference(x_odd, w, sw), atol=1e-5, rtol=1e-5), \
        "ragged-batch packed kernel mismatch"

    # 4) Large-K configuration (A*E > 256) takes the per-node-type grid + accumulator path.
    A2, E2, B2 = 4, 128, 8
    bound2 = math.sqrt(2.0) * math.sqrt(3.0 / (E2 * E2))
    w_big = jax.random.uniform(k_w3, (A2, E2, E2), dtype=jnp.float32,
                               minval=-bound2, maxval=bound2)
    sw_big = jax.random.normal(k_sw3, (1, A2, 1), dtype=jnp.float32)
    x_big = jax.random.normal(k_x3, (B2, A2, E2), dtype=jnp.float32)
    out_big = jax.block_until_ready(backward_attribute_gnn(x_big, w_big, sw_big))
    assert out_big.shape == (B2, E2)
    assert jnp.allclose(out_big, reference(x_big, w_big, sw_big), atol=1e-4, rtol=1e-4), \
        "per-type kernel mismatch"

    print("KERNEL_OK")
</pallas_src>

<mosaic_0001>
module attributes {stable_mosaic.version = 11 : i64} {
  func.func @_attr_gnn_packed_kernel(%arg0: i32, %arg1: memref<8x128xf32, #tpu.memory_space<vmem>>, %arg2: memref<128x128xf32, #tpu.memory_space<vmem>>, %arg3: memref<128x32xf32, #tpu.memory_space<vmem>>, %arg4: memref<8x32xf32, #tpu.memory_space<vmem>>) attributes {dimension_semantics = [#tpu.dimension_semantics<parallel>], iteration_bounds = array<i64: 1>, scalar_prefetch = 0 : i64, scratch_operands = 0 : i64, tpu.core_type = #tpu.core_type<tc>, window_params = [{transform_indices = @transform_0, window_bounds = array<i64: 8, 128>}, {pipeline_mode = #tpu.pipeline_mode<synchronous>, transform_indices = @transform_1, window_bounds = array<i64: 128, 128>}, {pipeline_mode = #tpu.pipeline_mode<synchronous>, transform_indices = @transform_2, window_bounds = array<i64: 128, 32>}, {transform_indices = @transform_3, window_bounds = array<i64: 8, 32>}]} {
    %c0 = arith.constant 0 : index
    %c0_0 = arith.constant 0 : index
    %0 = vector.load %arg1[%c0, %c0_0] : memref<8x128xf32, #tpu.memory_space<vmem>>, vector<8x128xf32>
    %c0_1 = arith.constant 0 : index
    %c0_2 = arith.constant 0 : index
    %1 = vector.load %arg2[%c0_1, %c0_2] : memref<128x128xf32, #tpu.memory_space<vmem>>, vector<128x128xf32>
    %cst = arith.constant dense<0.000000e+00> : vector<8x128xf32>
    %2 = tpu.matmul %0, %1, %cst {dimension_numbers = #tpu.dot_dimension_numbers<[1], [0], [0], [1], [0, 0, 1, 1], [], []>} : vector<8x128xf32>, vector<128x128xf32>, vector<8x128xf32> -> vector<8x128xf32>
    %cst_3 = arith.constant 0.000000e+00 : f32
    %3 = vector.broadcast %cst_3 : f32 to vector<8x128xf32>
    %4 = arith.maximumf %2, %3 : vector<8x128xf32>
    %c0_4 = arith.constant 0 : index
    %c0_5 = arith.constant 0 : index
    %5 = vector.load %arg3[%c0_4, %c0_5] : memref<128x32xf32, #tpu.memory_space<vmem>>, vector<128x32xf32>
    %cst_6 = arith.constant dense<0.000000e+00> : vector<8x32xf32>
    %6 = tpu.matmul %4, %5, %cst_6 {dimension_numbers = #tpu.dot_dimension_numbers<[1], [0], [0], [1], [0, 0, 1, 1], [], []>} : vector<8x128xf32>, vector<128x32xf32>, vector<8x32xf32> -> vector<8x32xf32>
    %c0_7 = arith.constant 0 : index
    %c0_8 = arith.constant 0 : index
    %7 = vector.load %arg4[%c0_7, %c0_8] : memref<8x32xf32, #tpu.memory_space<vmem>>, vector<8x32xf32>
    tpu.vector_store %arg4[%c0_7, %c0_8], %6 {strides = array<i32>} : memref<8x32xf32, #tpu.memory_space<vmem>>, vector<8x32xf32>,
    return
  }
  func.func @transform_0(%arg0: i32) -> (i32, i32) {
    %c0_i32 = arith.constant 0 : i32
    %c0_i32_0 = arith.constant 0 : i32
    return %arg0, %c0_i32 : i32, i32
  }
  func.func @transform_1(%arg0: i32) -> (i32, i32) {
    %c0_i32 = arith.constant 0 : i32
    %c0_i32_0 = arith.constant 0 : i32
    %c0_i32_1 = arith.constant 0 : i32
    return %c0_i32, %c0_i32_0 : i32, i32
  }
  func.func @transform_2(%arg0: i32) -> (i32, i32) {
    %c0_i32 = arith.constant 0 : i32
    %c0_i32_0 = arith.constant 0 : i32
    %c0_i32_1 = arith.constant 0 : i32
    return %c0_i32, %c0_i32_0 : i32, i32
  }
  func.func @transform_3(%arg0: i32) -> (i32, i32) {
    %c0_i32 = arith.constant 0 : i32
    %c0_i32_0 = arith.constant 0 : i32
    return %arg0, %c0_i32 : i32, i32
  }
}

</mosaic_0001>

<bundles_post_ra>
// kernel: tpu_custom_call.1
= control target key start
LH: loop header
LB: loop body
LE: loop exit
PB: predicated region body
PF: predicated region fallthrough
CT: control target
= control target key end

     0   :  { %v385_v3 = vmov 0.0|0.0   ;;  %vm386_vm0 = vmmov 0   ;;  %v387_v6 = vmov 0.0   ;;  %s536_s0 = inlined_call_operand.vmem [shape: f32[8,128], index: 0, kind: input, shape index: {}]   ;;  %s537_s1 = inlined_call_operand.vmem [shape: f32[128,128], index: 1, kind: input, shape index: {}]   ;;  %s538_s2 = inlined_call_operand.vmem [shape: f32[128,32], index: 2, kind: input, shape index: {}]   ;;  %s539_s3 = inlined_call_operand.hbm [shape: f32[8,32], index: 3, kind: output, shape index: {}]  }
   0x1   :  { %v16_v0 = vld [vmem:[%s537_s1] sm:$0xff]  ;;  %v17_v1 = vld [vmem:[%s537_s1 + $0x8] sm:$0xff]  ;;  %v18_v2 = vld [vmem:[%s537_s1 + $0x10] sm:$0xff]  ;;  %309 = vmatprep.subr.bf16.mxu0 %v385_v3  ;;  %271 = vmatprep.mubr.msk.f32.mxu0 %vm386_vm0, %v387_v6 }
   0x2   :  { %v310_v4 = vpack.c.bf16 %v17_v1, %v16_v0  ;;  %v19_v5 = vld [vmem:[%s537_s1 + $0x18] sm:$0xff]  ;;  %333 = vmatprep.subr.bf16.mxu1 %v385_v3  ;;  %306 = vmatprep.mubr.msk.f32.mxu1 %vm386_vm0, %v387_v6  ;;  %v20_v8 = vld [vmem:[%s537_s1 + $0x20] sm:$0xff]  ;;  %v21_v9 = vld [vmem:[%s537_s1 + $0x28] sm:$0xff] }
   0x3   :  { %v313_v7 = vpack.c.bf16 %v19_v5, %v18_v2  ;;  %v103_v10 = vld [vmem:[%s538_s2] sm:$0xff]  ;;  %v104_v11 = vld [vmem:[%s538_s2 + $0x8] sm:$0xff]  ;;  %v105_v12 = vld [vmem:[%s538_s2 + $0x10] sm:$0xff]  ;;  %v316_v14 = vpack.c.bf16 %v21_v9, %v20_v8 }
   0x4   :  { %311 = vmatpush3.bf16.msra.mxu0 %v310_v4  ;;  %v106_v13 = vld [vmem:[%s538_s2 + $0x18] sm:$0xff]  ;;  %v334_v15 = vpack.c.bf16 %v104_v11, %v103_v10  ;;  %v22_v16 = vld [vmem:[%s537_s1 + $0x30] sm:$0xff]  ;;  %v107_v19 = vld [vmem:[%s538_s2 + $0x20] sm:$0xff] }
   0x5   :  { %312 = vmatprep.subr.bf16.mxu0 %v385_v3  ;;  %v23_v17 = vld [vmem:[%s537_s1 + $0x38] sm:$0xff]  ;;  %v337_v18 = vpack.c.bf16 %v106_v13, %v105_v12  ;;  %v108_v20 = vld [vmem:[%s538_s2 + $0x28] sm:$0xff] }
   0x6   :  { %335 = vmatpush3.bf16.msra.mxu1 %v334_v15 }
   0x7   :  { %336 = vmatprep.subr.bf16.mxu1 %v385_v3 }
   0x8   :  { %314 = vmatpush3.bf16.msra.mxu0 %v313_v7 }
   0x9   :  { %315 = vmatprep.subr.bf16.mxu0 %v385_v3 }
   0xa   :  { %8 = vsyncpa [#allocation3], 0  ;;  %v319_v21 = vpack.c.bf16 %v23_v17, %v22_v16  ;;  %v24_v22 = vld [vmem:[%s537_s1 + $0x40] sm:$0xff]  ;;  %v25_v23 = vld [vmem:[%s537_s1 + $0x48] sm:$0xff]  ;;  %338 = vmatpush3.bf16.msra.mxu1 %v337_v18  ;;  %v340_v24 = vpack.c.bf16 %v108_v20, %v107_v19  ;;  %s388_s23 = smov [#allocation2]   ;;  %vm189_vm1 = vcmask 261120  }
   0xb   :  { %339 = vmatprep.subr.bf16.mxu1 %v385_v3  ;;  %v109_v25 = vld [vmem:[%s538_s2 + $0x30] sm:$0xff]  ;;  %v110_v26 = vld [vmem:[%s538_s2 + $0x38] sm:$0xff]  ;;  %v322_v27 = vpack.c.bf16 %v25_v23, %v24_v22  ;;  %v111_v31 = vld [vmem:[%s538_s2 + $0x40] sm:$0xff] }
   0xc   :  { %317 = vmatpush3.bf16.msra.mxu0 %v316_v14  ;;  %v26_v28 = vld [vmem:[%s537_s1 + $0x50] sm:$0xff]  ;;  %v27_v29 = vld [vmem:[%s537_s1 + $0x58] sm:$0xff]  ;;  %v343_v30 = vpack.c.bf16 %v110_v26, %v109_v25  ;;  %v112_v32 = vld [vmem:[%s538_s2 + $0x48] sm:$0xff] }
   0xd   :  { %318 = vmatprep.subr.bf16.mxu0 %v385_v3  ;;  %v325_v33 = vpack.c.bf16 %v27_v29, %v26_v28  ;;  %v28_v34 = vld [vmem:[%s537_s1 + $0x60] sm:$0xff]  ;;  %v29_v35 = vld [vmem:[%s537_s1 + $0x68] sm:$0xff]  ;;  %v346_v36 = vpack.c.bf16 %v112_v32, %v111_v31  ;;  %v113_v37 = vld [vmem:[%s538_s2 + $0x50] sm:$0xff] }
   0xe   :  { %341 = vmatpush3.bf16.msra.mxu1 %v340_v24  ;;  %v114_v38 = vld [vmem:[%s538_s2 + $0x58] sm:$0xff]  ;;  %v328_v39 = vpack.c.bf16 %v29_v35, %v28_v34  ;;  %v30_v40 = vld [vmem:[%s537_s1 + $0x70] sm:$0xff]  ;;  %v115_v43 = vld [vmem:[%s538_s2 + $0x60] sm:$0xff] }
   0xf   :  { %342 = vmatprep.subr.bf16.mxu1 %v385_v3  ;;  %v31_v41 = vld [vmem:[%s537_s1 + $0x78] sm:$0xff]  ;;  %v349_v42 = vpack.c.bf16 %v114_v38, %v113_v37  ;;  %v116_v44 = vld [vmem:[%s538_s2 + $0x68] sm:$0xff]  ;;  %v15_v47 = vld [vmem:[%s536_s0] sm:$0xff]  ;;  %s197_s0 = sshll.u32 %s388_s23, 4  ;;  %s198_s0 = int_to_ptr.vmem [resolvable:$true] %s197_s0 }
  0x10   :  { %320 = vmatpush3.bf16.msra.mxu0 %v319_v21  ;;  %v331_v45 = vpack.c.bf16 %v31_v41, %v30_v40  ;;  %v352_v46 = vpack.c.bf16 %v116_v44, %v115_v43  ;;  %v117_v48 = vld [vmem:[%s538_s2 + $0x70] sm:$0xff]  ;;  %v118_v49 = vld [vmem:[%s538_s2 + $0x78] sm:$0xff]  ;;  %s361_s24 = scalar_lea.vmem %s198_s0, 128  ;;  %p366_p1 = scmp.lt.s32.totalorder %s198_s0, %s198_s0 }
  0x11   :  { %321 = vmatprep.subr.bf16.mxu0 %v385_v3  ;;  %v355_v50 = vpack.c.bf16 %v118_v49, %v117_v48  ;;  %p362_p0 = scmp.ne.s32.totalorder %s198_s0, %s361_s24  ;;  %p367_p2 = scmp.lt.s32.totalorder %s361_s24, %s361_s24 }
  0x12   :  { %344 = vmatpush3.bf16.msra.mxu1 %v343_v30 }
  0x13   :  { %345 = vmatprep.subr.bf16.mxu1 %v385_v3  ;;  %p368_p3 = por %p367_p2, %p366_p1 }
  0x14   :  { %323 = vmatpush3.bf16.msra.mxu0 %v322_v27 }
  0x15   :  { %324 = vmatprep.subr.bf16.mxu0 %v385_v3  ;;  %p369_p4 = pnand %p368_p3, %p362_p0 }
  0x16   :  { %347 = vmatpush3.bf16.msra.mxu1 %v346_v36 }
  0x17   :  { %348 = vmatprep.subr.bf16.mxu1 %v385_v3 }
  0x18   :  { %326 = vmatpush3.bf16.msra.mxu0 %v325_v33 }
  0x19   :  { %327 = vmatprep.subr.bf16.mxu0 %v385_v3 }
  0x1a   :  { %350 = vmatpush3.bf16.msra.mxu1 %v349_v42 }
  0x1b   :  { %351 = vmatprep.subr.bf16.mxu1 %v385_v3 }
  0x1c   :  { %329 = vmatpush3.bf16.msra.mxu0 %v328_v39 }
  0x1d   :  { %330 = vmatprep.subr.bf16.mxu0 %v385_v3 }
  0x1e   :  { %353 = vmatpush3.bf16.msra.mxu1 %v352_v46 }
  0x1f   :  { %354 = vmatprep.subr.bf16.mxu1 %v385_v3 }
  0x20   :  { %332 = vmatpush3.bf16.msra.mxu0 %v331_v45 }
  0x22   :  { %356 = vmatpush3.bf16.msra.mxu1 %v355_v50 }
  0x23   :  { %272 = vmatmul.mubr.f32.vlgmr.msra.gmra.mrb[0].mxu0 %v15_v47 }
  0xf6   :  { %v98_v51 = vpop.f32.mrb[0].mxu0 }
  0xf7   :  { %v102_v52 = vmax.f32 %v98_v51, 0.0  ;;  %v273_v53 = vpop.f32.mrb[1].mxu0 }
  0xf9   :  { %307 = vmatmul.mubr.f32.vlgmr.msra.gmra.mrb[0].mxu1 %v102_v52 }
 0x1cc   :  { %v185_v54 = vpop.f32.mrb[0].mxu1 }
 0x1cd   :  { %190 = vst.msk [vmem:[#allocation2] sm:$0xff] %vm189_vm1, %v185_v54  ;;  %v308_v55 = vpop.f32.mrb[1].mxu1 }
 0x1ce   :  { %372 = shalt.err (!%p369_p4)
}
 0x1cf   :  { %s373_s26 = scalar_lea.hbm %s539_s3, 128 }
 0x1d0   :  { %p374_p5 = scmp.ne.s32.totalorder %s539_s3, %s373_s26  ;;  %p377_p6 = scmp.lt.u32.totalorder %s373_s26, %s539_s3 }
 0x1d2   :  { %p379_p7 = pnand %p377_p6, %p374_p5 }
 0x1d4   :  { %382 = shalt.err (!%p379_p7)
}
 0x1d5   :  { %200 = dma.vmem_to_hbm [thread:$0]  %s198_s0, 128, %s539_s3, [#allocation3]  }
 0x1d6   :  { %383 = dma.done.wait [#allocation3], 128  }
 0x1d7   :  { %384 = vsyncadd [#allocation3], 4294967168 }
 0x1d8   :  { %204 = vsyncpa [#allocation3], 1 }

</bundles_post_ra>
